<compile_context>
chip_gen: v7x
topology: tpu7x:2x2x1
jax: 0.10.0
libtpu: 0.0.40
codegen_flags: <defaults>
</compile_context>

<pallas_src>
import functools

import jax
import jax.numpy as jnp
from jax.experimental import pallas as pl
from jax.experimental.pallas import tpu as pltpu


def _round_up(x, m):
    return ((x + m - 1) // m) * m


# ---------------------------------------------------------------------------
# Generation-aware VMEM budget (queried once, conservative fallback).
# ---------------------------------------------------------------------------
_VMEM_CAP_CACHE = None


def _vmem_capacity_bytes():
    global _VMEM_CAP_CACHE
    if _VMEM_CAP_CACHE is None:
        cap = None
        try:
            info = pltpu.get_tpu_info()
            cap = getattr(info, "vmem_capacity_bytes", None)
        except Exception:
            cap = None
        _VMEM_CAP_CACHE = int(cap) if cap else (64 << 20)  # conservative: v7x
    return _VMEM_CAP_CACHE


def _vmem_budget_and_limit():
    cap = _vmem_capacity_bytes()
    budget = min(int(cap * 0.55), 96 << 20)   # working set for the tile buffers
    limit = min(int(cap * 0.80), 100 << 20)   # vmem_limit_bytes handed to Mosaic
    return budget, limit


# ---------------------------------------------------------------------------
# Kernel: one (TM, TN) tile of  out = x @ W + b  (MXU matmul, f32 accumulate).
# ---------------------------------------------------------------------------
def _gemm_bias_kernel(x_ref, w_ref, b_ref, o_ref):
    # In-kernel cast (VPU op, hides under the MXU). Avoids a separate XLA
    # cast pass that would rewrite all of x in HBM before the kernel runs.
    x = x_ref[...].astype(w_ref.dtype)
    acc = jnp.dot(x, w_ref[...], preferred_element_type=jnp.float32)
    o_ref[...] = (acc + b_ref[...]).astype(o_ref.dtype)


def _pick_tiles(m, c, n_out, x_bytes, w_bytes, out_bytes, budget, tile_m, tile_n):
    """Choose (TM, TN) with double-buffer-aware VMEM accounting."""
    # ---- N (output-column) tile: stream the weight over n_out. ----
    if tile_n is not None:
        tn = int(tile_n)
    elif n_out <= 1024:
        tn = n_out            # full width (lane-dense, also handles n_out % 128 != 0)
    else:
        tn = 1024             # multiple of 256: dense MXU passes on v6e/v7x
        while tn > 256 and 2 * c * tn * w_bytes > budget // 2:
            tn -= 256

    # Pallas allocates 2 buffers per input even with a constant index_map,
    # so count the weight & bias blocks twice; bias pads to 8 sublanes.
    wb_bytes = 2 * (c * tn * w_bytes + 8 * _round_up(tn, 128) * 4)
    per_row = 2 * (c * x_bytes + tn * out_bytes)    # dbl-buffered x + out, per row

    # ---- M (row) tile. ----
    if tile_m is not None:
        tm = max(8, _round_up(int(tile_m), 8))
    else:
        avail = max(budget - wb_bytes, per_row * 8)
        tm = max(8, min(1024, avail // per_row))
        if tm >= 256:
            tm = (tm // 256) * 256      # MXU-aligned on v6e/v7x (also /128 on v5e)
        elif tm >= 128:
            tm = 128
        else:
            tm = (tm // 8) * 8
        # Keep >= 2 row blocks so the "parallel" M axis can shard across
        # v7x's two TensorCores instead of leaving one idle.
        if m > 512 and tm >= m:
            tm = max(256, _round_up((m + 1) // 2, 256))
    tm = min(tm, _round_up(m, 8))
    return int(tm), int(tn), int(wb_bytes), int(per_row)


def _tiled_gemm_bias(x2d, w, b, out_dtype, *, tile_m=None, tile_n=None):
    """out[m, n] = x2d[m, c] @ w[c, n] + b[0, n], tiled over rows and columns."""
    m, c = x2d.shape
    n_out = w.shape[1]
    x_bytes = jnp.dtype(x2d.dtype).itemsize
    w_bytes = jnp.dtype(w.dtype).itemsize
    out_bytes = jnp.dtype(out_dtype).itemsize

    budget, limit_cap = _vmem_budget_and_limit()
    tm, tn, wb_bytes, per_row = _pick_tiles(
        m, c, n_out, x_bytes, w_bytes, out_bytes, budget, tile_m, tile_n)

    grid = (pl.cdiv(m, tm), pl.cdiv(n_out, tn))   # ragged last blocks masked by Pallas

    vmem_need = wb_bytes + tm * per_row
    vmem_limit = int(min(max(vmem_need + (4 << 20), 16 << 20), limit_cap))

    cost = pl.CostEstimate(
        flops=2 * m * c * n_out,
        transcendentals=0,
        bytes_accessed=(m * c * x_bytes + c * n_out * w_bytes
                        + n_out * 4 + m * n_out * out_bytes),
    )

    return pl.pallas_call(
        _gemm_bias_kernel,
        out_shape=jax.ShapeDtypeStruct((m, n_out), out_dtype),
        grid=grid,
        in_specs=[
            pl.BlockSpec((tm, c), lambda i, j: (i, 0)),   # activations: row tile
            pl.BlockSpec((c, tn), lambda i, j: (0, j)),   # weight: column tile (streamed)
            pl.BlockSpec((1, tn), lambda i, j: (0, j)),   # bias (f32)
        ],
        out_specs=pl.BlockSpec((tm, tn), lambda i, j: (i, j)),
        compiler_params=pltpu.CompilerParams(
            dimension_semantics=("parallel", "parallel"),
            vmem_limit_bytes=vmem_limit,
        ),
        cost_estimate=cost,
    )(x2d, w, b)


# ---------------------------------------------------------------------------
# One-time parameter prep (call at init, NOT per forward): fuse Q/KV weights
# for the self-attention path and pre-cast to the MXU compute dtype so the hot
# path does no HBM-level concat/cast passes.
# ---------------------------------------------------------------------------
def prepare_linear_projection_params(wq, bq, wkv, bkv, compute_dtype=jnp.bfloat16):
    return {
        "w_qkv": jnp.concatenate([wq, wkv], axis=1).astype(compute_dtype),
        "b_qkv": jnp.concatenate([bq, bkv], axis=0).astype(jnp.float32)[None, :],
        "w_q": jnp.asarray(wq, compute_dtype),
        "b_q": jnp.asarray(bq, jnp.float32)[None, :],
        "w_kv": jnp.asarray(wkv, compute_dtype),
        "b_kv": jnp.asarray(bkv, jnp.float32)[None, :],
    }


# ---------------------------------------------------------------------------
# LinearProjection.forward
# ---------------------------------------------------------------------------
@functools.partial(
    jax.jit,
    static_argnames=("heads", "tile_m", "tile_n", "kv_pallas_min_rows"))
def linear_projection(x, params, heads, attn_kv=None, *, tile_m=None,
                      tile_n=None, kv_pallas_min_rows=128):
    """Pallas implementation of LinearProjection.forward.

    x: (B, N, C); attn_kv: optional (N_kv, C) shared across the batch.
    Returns q: (B, heads, N, C//heads), k, v: (B, heads, N_kv, C//heads).
    """
    B, N, C = x.shape
    inner_dim = params["w_q"].shape[1]
    # The PyTorch forward reshapes with C // heads, which only works when
    # inner_dim == C (dim_head = dim // heads).
    assert inner_dim == C, "LinearProjection.forward assumes inner_dim == C"
    head_dim = C // heads
    out_dtype = x.dtype

    x_flat = x.reshape(B * N, C)          # native dtype; bf16 cast happens in-kernel

    if attn_kv is None:
        # Self-attention: one fused (C, 3*inner_dim) matmul over x.
        out = _tiled_gemm_bias(x_flat, params["w_qkv"], params["b_qkv"],
                               out_dtype, tile_m=tile_m, tile_n=tile_n)
        q_flat = out[:, :inner_dim]
        kv_flat = out[:, inner_dim:]
        q = q_flat.reshape(B, N, heads, head_dim).transpose(0, 2, 1, 3)
        kv = kv_flat.reshape(B, N, 2, heads, head_dim).transpose(2, 0, 3, 1, 4)
        return q, kv[0], kv[1]
    else:
        # Cross-attention: q over (B*N, C); kv projected ONCE on (N_kv, C) and
        # broadcast over the batch (matches unsqueeze(0).repeat(B, 1, 1)).
        N_kv = attn_kv.shape[0]
        q_flat = _tiled_gemm_bias(x_flat, params["w_q"], params["b_q"],
                                  out_dtype, tile_m=tile_m, tile_n=tile_n)
        if N_kv >= kv_pallas_min_rows:
            kv_small = _tiled_gemm_bias(attn_kv, params["w_kv"], params["b_kv"],
                                        out_dtype, tile_m=tile_m, tile_n=tile_n)
        else:
            # Tiny GEMM: a one-tile pallas_call just pays launch + weight-DMA
            # overhead; let XLA handle it.
            acc = (jnp.dot(attn_kv.astype(params["w_kv"].dtype), params["w_kv"],
                           preferred_element_type=jnp.float32) + params["b_kv"])
            kv_small = acc.astype(out_dtype)
        q = q_flat.reshape(B, N, heads, head_dim).transpose(0, 2, 1, 3)
        kv = kv_small.reshape(N_kv, 2, heads, head_dim).transpose(1, 2, 0, 3)
        kv = jnp.broadcast_to(kv[:, None], (2, B, heads, N_kv, head_dim))
        return q, kv[0], kv[1]


if __name__ == "__main__":
    # Module config (inner_dim == dim, as the PyTorch forward's reshape assumes).
    dim = 32
    heads = 8
    dim_head = dim // heads            # 4 -> inner_dim = 32 == dim
    inner_dim = dim_head * heads

    B, N, C = 2, 24, dim               # B*N = 48 rows -> 3 row tiles with tile_m=16
    N_kv = 16

    key = jax.random.PRNGKey(0)
    kx, kkv, kwq, kbq, kwkv, kbkv = jax.random.split(key, 6)

    x = jax.random.normal(kx, (B, N, C), dtype=jnp.float32)
    attn_kv = jax.random.normal(kkv, (N_kv, C), dtype=jnp.float32)
    # PyTorch Linear stores weight as (out, in); we pass the transposed (in, out).
    wq = jax.random.normal(kwq, (C, inner_dim), dtype=jnp.float32) * 0.02
    bq = jax.random.normal(kbq, (inner_dim,), dtype=jnp.float32) * 0.02
    wkv = jax.random.normal(kwkv, (C, 2 * inner_dim), dtype=jnp.float32) * 0.02
    bkv = jax.random.normal(kbkv, (2 * inner_dim,), dtype=jnp.float32) * 0.02

    # One-time weight fusion / bf16 cast (hoisted out of the hot path).
    params = prepare_linear_projection_params(wq, bq, wkv, bkv)

    # Reference with the same bf16-input / f32-accumulate semantics as the kernel.
    def ref_gemm(a, w, b):
        return jnp.dot(a.astype(jnp.bfloat16), w.astype(jnp.bfloat16),
                       preferred_element_type=jnp.float32) + b

    x2 = x.reshape(B * N, C)
    q_ref = ref_gemm(x2, wq, bq).reshape(B, N, heads, dim_head).transpose(0, 2, 1, 3)
    kv_ref = ref_gemm(x2, wkv, bkv).reshape(B, N, 2, heads, dim_head).transpose(2, 0, 3, 1, 4)

    # --- self-attention path (attn_kv is None): fused QKV projection ---
    q, k, v = linear_projection(x, params, heads=heads, tile_m=16)
    jax.block_until_ready((q, k, v))
    assert q.shape == (B, heads, N, dim_head)
    assert k.shape == (B, heads, N, dim_head)
    assert v.shape == (B, heads, N, dim_head)
    assert jnp.allclose(q, q_ref, atol=2e-3)
    assert jnp.allclose(k, kv_ref[0], atol=2e-3)
    assert jnp.allclose(v, kv_ref[1], atol=2e-3)

    # --- cross-attention path (attn_kv given; projected once, broadcast over B) ---
    q2, k2, v2 = linear_projection(x, params, heads=heads, attn_kv=attn_kv, tile_m=16)
    jax.block_until_ready((q2, k2, v2))

    kv2_ref = jnp.broadcast_to(ref_gemm(attn_kv, wkv, bkv)[None],
                               (B, N_kv, 2 * inner_dim))
    kv2_ref = kv2_ref.reshape(B, N_kv, 2, heads, dim_head).transpose(2, 0, 3, 1, 4)
    assert q2.shape == (B, heads, N, dim_head)
    assert k2.shape == (B, heads, N_kv, dim_head)
    assert v2.shape == (B, heads, N_kv, dim_head)
    assert jnp.allclose(q2, q_ref, atol=2e-3)
    assert jnp.allclose(k2, kv2_ref[0], atol=2e-3)
    assert jnp.allclose(v2, kv2_ref[1], atol=2e-3)

    print("KERNEL_OK")
</pallas_src>

<mosaic_0001>
module attributes {stable_mosaic.version = 11 : i64} {
  func.func @_gemm_bias_kernel(%arg0: i32, %arg1: i32, %arg2: memref<16x32xf32, #tpu.memory_space<vmem>>, %arg3: memref<32x96xbf16, #tpu.memory_space<vmem>>, %arg4: memref<1x96xf32, #tpu.memory_space<vmem>>, %arg5: memref<16x96xf32, #tpu.memory_space<vmem>>) attributes {dimension_semantics = [#tpu.dimension_semantics<parallel>, #tpu.dimension_semantics<parallel>], iteration_bounds = array<i64: 3, 1>, scalar_prefetch = 0 : i64, scratch_operands = 0 : i64, tpu.core_type = #tpu.core_type<tc>, window_params = [{transform_indices = @transform_0, window_bounds = array<i64: 16, 32>}, {transform_indices = @transform_1, window_bounds = array<i64: 32, 96>}, {transform_indices = @transform_2, window_bounds = array<i64: 1, 96>}, {transform_indices = @transform_3, window_bounds = array<i64: 16, 96>}]} {
    %c0 = arith.constant 0 : index
    %c0_0 = arith.constant 0 : index
    %0 = vector.load %arg2[%c0, %c0_0] : memref<16x32xf32, #tpu.memory_space<vmem>>, vector<16x32xf32>
    %1 = arith.truncf %0 : vector<16x32xf32> to vector<16x32xbf16>
    %c0_1 = arith.constant 0 : index
    %c0_2 = arith.constant 0 : index
    %2 = vector.load %arg3[%c0_1, %c0_2] : memref<32x96xbf16, #tpu.memory_space<vmem>>, vector<32x96xbf16>
    %cst = arith.constant dense<0.000000e+00> : vector<16x96xf32>
    %3 = tpu.matmul %1, %2, %cst {dimension_numbers = #tpu.dot_dimension_numbers<[1], [0], [0], [1], [0, 0, 1, 1], [], []>} : vector<16x32xbf16>, vector<32x96xbf16>, vector<16x96xf32> -> vector<16x96xf32>
    %c0_3 = arith.constant 0 : index
    %c0_4 = arith.constant 0 : index
    %4 = vector.load %arg4[%c0_3, %c0_4] : memref<1x96xf32, #tpu.memory_space<vmem>>, vector<1x96xf32>
    %5 = vector.broadcast %4 : vector<1x96xf32> to vector<16x96xf32>
    %6 = arith.addf %3, %5 : vector<16x96xf32>
    %c0_5 = arith.constant 0 : index
    %c0_6 = arith.constant 0 : index
    %7 = vector.load %arg5[%c0_5, %c0_6] : memref<16x96xf32, #tpu.memory_space<vmem>>, vector<16x96xf32>
    tpu.vector_store %arg5[%c0_5, %c0_6], %6 {strides = array<i32>} : memref<16x96xf32, #tpu.memory_space<vmem>>, vector<16x96xf32>,
    return
  }
  func.func @transform_0(%arg0: i32, %arg1: i32) -> (i32, i32) {
    %c0_i32 = arith.constant 0 : i32
    %c0_i32_0 = arith.constant 0 : i32
    return %arg0, %c0_i32 : i32, i32
  }
  func.func @transform_1(%arg0: i32, %arg1: i32) -> (i32, i32) {
    %c0_i32 = arith.constant 0 : i32
    %c0_i32_0 = arith.constant 0 : i32
    return %c0_i32, %arg1 : i32, i32
  }
  func.func @transform_2(%arg0: i32, %arg1: i32) -> (i32, i32) {
    %c0_i32 = arith.constant 0 : i32
    %c0_i32_0 = arith.constant 0 : i32
    return %c0_i32, %arg1 : i32, i32
  }
  func.func @transform_3(%arg0: i32, %arg1: i32) -> (i32, i32) {
    %c0_i32 = arith.constant 0 : i32
    return %arg0, %arg1 : i32, i32
  }
}

</mosaic_0001>

<bundles_post_ra>
// kernel: linear_projection.1
= control target key start
LH: loop header
LB: loop body
LE: loop exit
PB: predicated region body
PF: predicated region fallthrough
CT: control target
= control target key end

     0   :  { %8 = vsyncpa [#allocation3], 0  ;;  %s842_s0 = inlined_call_operand.hbm [shape: f32[48,32], index: 0, kind: input, shape index: {}]   ;;  %s843_s1 = inlined_call_operand.hbm [shape: bf16[32,96], index: 1, kind: input, shape index: {}]   ;;  %s844_s2 = inlined_call_operand.vmem [shape: f32[1,96], index: 2, kind: input, shape index: {}]   ;;  %s845_s3 = inlined_call_operand.vmem [shape: f32[48,96], index: 3, kind: output, shape index: {}]  }
   0x1   :  { %10 = vsyncpa [#allocation3 + $0x1], 0 }
   0x2   :  { %11 = vsyncpa [#allocation5], 0  ;;  %s682_s12 = smov 0   ;;  %s684_s13 = smov 0  }
   0x3   :  { %s686_s14 = smov 0   ;;  %s688_s15 = smov 0  }
   0x4   :  { %s690_s16 = smov 0   ;;  %s692_s17 = smov 0  }
   0x5 LB: > { %s434_s18 = sadd.s32 4294967295, %s652_s17   ;;  %p49_p0 = scmp.ne.s32.totalorder %s636_s13, %s632_s12  ;;  %s652_s17 = sphi %s692_s17, %s17_s17   ;;  %s648_s16 = sphi %s690_s16, %s862_s16   ;;  %s644_s15 = sphi %s688_s15, %s861_s15   ;;  %s640_s14 = sphi %s686_s14, %s860_s14   ;;  %s636_s13 = sphi %s684_s13, %s859_s13   ;;  %s632_s12 = sphi %s682_s12, %s858_s12  }
   0x6   : > { %p712_p1 = scmp.eq.s32.totalorder %s434_s18, 0  ;;  %p436_p2 = scmp.ge.s32.totalorder %s652_s17, 1 }
   0x7   : > { %p140_p3 = scmp.lt.s32.totalorder %s652_s17, 4  ;;  %s654_s22 = smov [#allocation4]  }
   0x8   : > { %s850_s19 = scalar_select %p712_p1, 1, 0 }
   0x9   : > { %p720_p4 = por %p712_p1, %p49_p0  ;;  %p724_p5 = pnand %p436_p2, %p140_p3 }
   0xa   : > { %s154_s23 = sshll.u32 %s654_s22, 4  ;;  %s29_s25 = sadd.s32 1, %s648_s16  ;;  %s155_s23 = int_to_ptr.vmem [resolvable:$true] %s154_s23 }
   0xb   : > { %s851_s20 = scalar_select %p720_p4, 1, 0 }
   0xc   : > { %s852_s21 = scalar_select %p724_p5, 1, 0 }
   0xd   : > { %p472_p6 = pneg %p724_p5  ;;  %s540_s28 = scalar_lea.hbm %s843_s1, 256 }
   0xe   : > { %p541_p8 = scmp.ne.s32.totalorder %s843_s1, %s540_s28  ;;  %p547_p12 = scmp.lt.u32.totalorder %s540_s28, %s843_s1 }
   0xf   : > { %p732_p7 = pnand %p472_p6, %p712_p1 }
  0x11   : > { %p542_p9 = pneg %p732_p7 }
  0x13   : > { %p543_p10 = pnand %p542_p9, %p541_p8 }
  0x15   : > { %p544_p11 = pneg %p543_p10 }
  0x17   : > { %p549_p13 = pnand %p547_p12, %p544_p11 }
  0x19   : > { %552 = shalt.err (!%p549_p13)
}
  0x1a   : > { %s553_s6 = scalar_lea.vmem %s155_s23, 256  ;;  %p561_p6 = scmp.lt.s32.totalorder %s155_s23, %s155_s23 }
  0x1b   : > { %p554_p0 = scmp.ne.s32.totalorder %s155_s23, %s553_s6  ;;  %p562_p1 = scmp.lt.s32.totalorder %s553_s6, %s553_s6 }
  0x1d   : > { %p556_p2 = pnand %p554_p0, %p542_p9  ;;  %p563_p4 = por %p562_p1, %p561_p6 }
  0x1f   : > { %p557_p3 = pneg %p556_p2 }
  0x21   : > { %p564_p5 = pnand %p563_p4, %p557_p3 }
  0x23   : > { %567 = shalt.err (!%p564_p5)
}
  0x24   : > { %s655_s7 = smov 64   ;;  %s656_s8 = smov 4  }
  0x25   : > { %475 = dma.hbm_to_vmem [thread:$0]  (!%p732_p7), %s843_s1, 256, %s155_s23, [#allocation5], %s655_s7, %s655_s7, %s656_s8  }
  0x26   : > { %p31_p1 = scmp.ge.s32.totalorder %s29_s25, 3  ;;  %s36_s11 = sadd.s32 1, %s640_s14 }
  0x27   : > { %p43_p4 = scmp.ne.s32.totalorder %s640_s14, %s636_s13  ;;  %p44_p5 = scmp.eq.s32.totalorder %s652_s17, 0 }
  0x28   : > { %s864_s25 = smov (%p31_p1, %s29_s25), 0  ;;  %p481_p9 = scmp.lt.s32.totalorder %s652_s17, 3 }
  0x29   : > { %p45_p8 = por %p44_p5, %p43_p4  ;;  %s33_s12 = ssub.s32 %s648_s16, %s864_s25 }
  0x2a   : > { %s174_s18 = sand.u32 1, %s640_s14   ;;  %p34_p10 = scmp.eq.s32.totalorder %s33_s12, 0 }
  0x2b   : > { %s440_s22 = sshll.u32 %s174_s18, 4  ;;  %s454_s26 = sshll.u32 %s648_s16, 8 }
  0x2c   : > { %s765_s27 = scalar_select %p34_p10, %s640_s14, %s36_s11  }
  0x2d   : > { %s770_s23 = scalar_lea.hbm %s842_s0, %s454_s26  ;;  %s178_s29 = scalar_lea.vmem [#allocation2], %s440_s22 }
  0x2e   : > { %s185_s30 = sshll.u32 %s178_s29, 4  ;;  %p772_p7 = pnand %p481_p9, %p45_p8  ;;  %s776_s30 = int_to_ptr.vmem [resolvable:$true] %s185_s30 }
  0x2f   : > { %s778_s5 = scalar_lea.sflag [#allocation3], %s174_s18  ;;  %s568_s6 = scalar_lea.hbm %s770_s23, 256 }
  0x30   : > { %p569_p11 = scmp.ne.s32.totalorder %s770_s23, %s568_s6  ;;  %p570_p12 = pneg %p772_p7 }
  0x31   : > { %s573_s9 = scalar_lea.hbm %s842_s0, 768  ;;  %p574_p2 = scmp.lt.u32.totalorder %s770_s23, %s842_s0 }
  0x32   : > { %p571_p13 = pnand %p570_p12, %p569_p11  ;;  %p575_p3 = scmp.lt.u32.totalorder %s573_s9, %s568_s6 }
  0x33   : > { %p577_p1 = scmp.lt.u32.totalorder %s568_s6, %s770_s23 }
  0x34   : > { %p572_p0 = pneg %p571_p13  ;;  %p576_p6 = por %p575_p3, %p574_p2 }
  0x36   : > { %p578_p4 = por %p577_p1, %p576_p6 }
  0x38   : > { %p579_p5 = pnand %p578_p4, %p572_p0 }
  0x3a   : > { %582 = shalt.err (!%p579_p5)
}
  0x3b   : > { %s583_s12 = scalar_lea.vmem %s776_s30, 256  ;;  %s657_s18 = smov [#allocation2]  }
  0x3c   : > { %p584_p8 = scmp.ne.s32.totalorder %s776_s30, %s583_s12  ;;  %s588_s22 = sshll.u32 %s657_s18, 4  ;;  %s589_s22 = int_to_ptr.vmem [resolvable:$false] %s588_s22 }
  0x3d   : > { %s590_s26 = scalar_lea.vmem %s589_s22, 512  ;;  %p591_p11 = scmp.lt.s32.totalorder %s776_s30, %s589_s22 }
  0x3e   : > { %p586_p9 = pnand %p584_p8, %p570_p12  ;;  %p592_p13 = scmp.lt.s32.totalorder %s590_s26, %s583_s12 }
  0x40   : > { %p587_p10 = pneg %p586_p9  ;;  %p593_p2 = por %p592_p13, %p591_p11 }
  0x42   : > { %p594_p3 = pnand %p593_p2, %p587_p10 }
  0x44   : > { %597 = shalt.err (!%p594_p3)
}
  0x45   : > { %s658_s24 = smov 128   ;;  %s659_s28 = smov 8  }
  0x46   : > { %479 = dma.hbm_to_vmem [thread:$0]  (!%p772_p7), %s770_s23, 256, %s776_s30, %s778_s5, %s658_s24, %s658_s24, %s659_s28  }
  0x47   : > { %p855_p12 = scmp.ne.s32.totalorder %s852_s21, 0 }
  0x48   : > { %s199_s29 = sand.u32 (!%p855_p12), 1, %s636_s13   ;;  %p856_p0 = scmp.ne.s32.totalorder (!%p855_p12), %s851_s20, 0 }
  0x49   : > { %197 = sbr.rel (%p855_p12) target bundleno = 310 (0x136), region = 32  ;;  %s444_s6 = sshll.u32 (!%p855_p12), %s199_s29, 4 }
  0x4a   : > { %s200_s7 = scalar_lea.sflag (!%p855_p12), [#allocation3], %s199_s29  ;;  %s203_s8 = scalar_lea.vmem (!%p855_p12), [#allocation2], %s444_s6 }
  0x50   : > { %623 = dma.done.wait (%p856_p0), %s200_s7, 256  }
  0x51   : > { %625 = vsyncadd (%p856_p0), %s200_s7, 4294967040  ;;  %p857_p6 = scmp.ne.s32.totalorder %s850_s19, 0 }
  0x53   : > { %627 = dma.done.wait (%p857_p6), [#allocation5], 256  }
  0x54   : > { %629 = vsyncadd (%p857_p6), [#allocation5], 4294967040  ;;  %v660_v0 = vmov 0.0   ;;  %vm661_vm0 = vmmov 0   ;;  %v538_v1 = vld [vmem:[#allocation4] sm:$0xff]   ;;  %v539_v2 = vld [vmem:[#allocation4 + $0x8] sm:$0xff]  }
  0x55   : > { %458 = vmatprep.subr.bf16.mxu0 %v660_v0  ;;  %462 = vmatprep.mubr.msk.bf16.mxu0 %vm661_vm0, %v660_v0  ;;  %v250_v3 = vld [vmem:[%s203_s8] sm:$0xff]  ;;  %v251_v4 = vld [vmem:[%s203_s8 + $0x8] sm:$0xff]  ;;  %vm276_vm1 = vcmask 261120   ;;  %s446_s20 = sshll.u32 %s644_s15, 1  ;;  %vm321_vm2 = vcmask 785408  }
  0x56   : > { %459 = vmatpush3.bf16.msra.mxu0 %v538_v1  ;;  %v252_v5 = vpack.c.bf16 %v251_v4, %v250_v3  ;;  %p241_p7 = scmp.lt.s32.totalorder %s446_s20, 5  ;;  %v448_v6 = vld [vmem:[%s844_s2] ss:$0 sm:$0xff] }
  0x57   : > { %460 = vmatprep.subr.bf16.mxu0 %v660_v0 }
  0x58   : > { %s866_s20 = smov (!%p241_p7, %s446_s20), 5 }
  0x59   : > { %s447_s19 = sshll.u32 %s866_s20, 3 }
  0x5a   : > { %461 = vmatpush3.bf16.msra.mxu0 %v539_v2  ;;  %s247_s5 = scalar_lea.vmem %s845_s3, %s447_s19 }
  0x5d   : > { %463 = vmatmul.mubr.msk.bf16.vlgmr.msra.gmra.mrb[0].mxu0 %vm276_vm1, %v252_v5 }
 0x130   : > { %v314_v7 = vpop.f32.mrb[0].mxu0 }
 0x131   : > { %v315_v8 = vadd.f32 %v448_v6, %v314_v7  ;;  %v464_v9 = vpop.f32.mrb[1].mxu0 }
 0x132   : > { %v317_v10 = vpop.f32.mrb[2].mxu0 }
 0x133   : > { %322 = vst.msk [vmem:[%s247_s5] sm:$0xff] %vm321_vm2, %v315_v8  ;;  %v318_v11 = vadd.f32 %v448_v6, %v317_v10  ;;  %v465_v12 = vpop.f32.mrb[3].mxu0 }
 0x135   : > { %323 = vst.msk [vmem:[%s247_s5 + $0x8] sm:$0xff] %vm321_vm2, %v318_v11 }
 0x136 PF: > { %s17_s17 = sadd.s32 1, %s652_s17   ;;  %s858_s12 = smov %s636_s13 }
 0x137   : > { %p14_p1 = scmp.ge.s32.totalorder %s17_s17, 5   ;;  %s859_s13 = smov %s640_s14 }
 0x138   : > { %s860_s14 = smov %s765_s27  ;;  %s861_s15 = smov %s648_s16 }
 0x139   : > { %s862_s16 = smov %s864_s25  ;;  %16 = sbr.rel (!%p14_p1) target bundleno = 5 (0x5), region = 80 }
 0x140   :  { %352 = vsyncpa [#allocation3], 1 }
 0x141   :  { %354 = vsyncpa [#allocation3 + $0x1], 1 }
 0x142   :  { %355 = vsyncpa [#allocation5], 1 }

</bundles_post_ra>
